<compile_context>
chip_gen: v5e
topology: v5e:2x2
jax: 0.10.0
libtpu: 0.0.40
codegen_flags: <defaults>
</compile_context>

<pallas_src>
import jax
import jax.numpy as jnp
from jax.experimental import pallas as pl
from jax.experimental.pallas import tpu as pltpu


def _round_up(v, m):
    return ((v + m - 1) // m) * m


def _erf(z):
    # Abramowitz & Stegun 7.1.26, max abs error ~1.5e-7.
    p = 0.3275911
    a1, a2, a3, a4, a5 = (0.254829592, -0.284496736, 1.421413741,
                          -1.453152027, 1.061405429)
    az = jnp.abs(z)
    t = 1.0 / (1.0 + p * az)
    poly = ((((a5 * t + a4) * t + a3) * t + a2) * t + a1) * t
    e = 1.0 - poly * jnp.exp(-az * az)
    return jnp.where(z < 0.0, -e, e)


def _gelu_exact(x):
    # PyTorch nn.GELU() default: 0.5 * x * (1 + erf(x / sqrt(2))).
    return 0.5 * x * (1.0 + _erf(x * 0.7071067811865476))


def _mlp2_kernel(x_ref, gth_ref, w1_ref, b1_ref, w2_ref, b2_ref,
                 y_ref, tmask_ref):
    x = x_ref[...].astype(jnp.float32)                                # (C, TL)
    # Token gate: sign(mean_c(|x| - th)) == sign(sum_c(|x| - th)).
    g = jnp.sum(jnp.abs(x) - gth_ref[...], axis=0, keepdims=True)     # (1, TL)
    t_mask = (g > 0.0).astype(jnp.float32)                            # (1, TL)

    xg = (x * t_mask).astype(w1_ref.dtype)                            # (C, TL)
    h = jnp.dot(w1_ref[...], xg,
                preferred_element_type=jnp.float32) + b1_ref[...]     # (HID, TL)
    h = _gelu_exact(h) * t_mask
    y = jnp.dot(w2_ref[...], h.astype(w2_ref.dtype),
                preferred_element_type=jnp.float32) + b2_ref[...]     # (C_out, TL)

    y_ref[...] = y.astype(y_ref.dtype)
    tmask_ref[...] = t_mask


def mlp2_forward(x, w1, b1, th1, w2, b2, th2, gate_th, *,
                 block_tokens=1024, weight_dtype=None):
    """Mlp2 forward.

    x:(B,C,H,W)  w1:(HID,C) b1:(HID,) th1:(HID,1)
    w2:(C_out,HID) b2:(C_out,) th2:(C_out,1)  gate_th:(1,1,C)
    Returns (y[B,C_out,H,W], t_mask[B,L,1], (c_mask1_mean[1], c_mask2_mean[1])).
    """
    B, C, H, W = x.shape
    HID = w1.shape[0]
    C_out = w2.shape[0]
    L = H * W
    if weight_dtype is None:
        weight_dtype = x.dtype   # use jnp.bfloat16 for large real C / HID

    # ---- weight-only channel masks (PrunedLinear) — tiny, plain JAX --------
    c_mask1 = ((jnp.abs(w1) - th1).mean(axis=0) > 0.0).astype(jnp.float32)   # (C,)
    c_mask2 = ((jnp.abs(w2) - th2).mean(axis=0) > 0.0).astype(jnp.float32)   # (HID,)
    w1m = (w1 * c_mask1[None, :]).astype(weight_dtype)            # (HID, C)
    w2m = (w2 * c_mask2[None, :]).astype(weight_dtype)            # (C_out, HID)
    b1c = b1.reshape(HID, 1).astype(jnp.float32)
    b2c = b2.reshape(C_out, 1).astype(jnp.float32)
    gthc = gate_th.reshape(C, 1).astype(jnp.float32)

    # ---- token tiling: tokens are the lane axis -----------------------------
    x_isz = jnp.dtype(x.dtype).itemsize
    w_isz = jnp.dtype(weight_dtype).itemsize

    def _tile_bytes(rows, cols, isz):
        # VMEM footprint of one tile (sublanes pad to 8, lanes to 128).
        return _round_up(max(rows, 1), 8) * _round_up(max(cols, 1), 128) * isz

    def _est_vmem(tl):
        resident = (_tile_bytes(C, 1, 4) + _tile_bytes(HID, C, w_isz)
                    + _tile_bytes(HID, 1, 4) + _tile_bytes(C_out, HID, w_isz)
                    + _tile_bytes(C_out, 1, 4))
        per_block = (_tile_bytes(C, tl, x_isz) + _tile_bytes(C_out, tl, x_isz)
                     + _tile_bytes(1, tl, 4)
                     + _tile_bytes(HID, tl, 4))       # f32 hidden intermediate
        return 2 * (resident + per_block)             # double-buffered pipeline

    if L <= block_tokens:
        TL = L                                        # full-dim block is legal
    else:
        TL = max(128, (block_tokens // 128) * 128)
    # VMEM budget cap — conservative enough for v7x (64 MiB physical VMEM).
    VMEM_BUDGET = 24 << 20
    while TL > 128 and _est_vmem(TL) > VMEM_BUDGET:
        TL = max(128, (TL // 2 // 128) * 128 or 128)
    Lp = _round_up(L, TL)
    vmem_limit = int(min(2 * VMEM_BUDGET, max(2 * _est_vmem(TL), 8 << 20)))

    x3 = x.reshape(B, C, L)                           # free view, no transpose
    if Lp != L:
        x3 = jnp.pad(x3, ((0, 0), (0, 0), (0, Lp - L)))

    grid = (B, Lp // TL)

    y_p, tmask_p = pl.pallas_call(
        _mlp2_kernel,
        out_shape=(
            jax.ShapeDtypeStruct((B, C_out, Lp), x.dtype),
            jax.ShapeDtypeStruct((B, 1, Lp), jnp.float32),
        ),
        grid_spec=pltpu.PrefetchScalarGridSpec(
            num_scalar_prefetch=0,
            grid=grid,
            in_specs=[
                pl.BlockSpec((None, C, TL), lambda b, l: (b, 0, l)),   # x block
                pl.BlockSpec((C, 1), lambda b, l: (0, 0)),       # gate threshold
                pl.BlockSpec((HID, C), lambda b, l: (0, 0)),     # fc1 W (masked)
                pl.BlockSpec((HID, 1), lambda b, l: (0, 0)),     # fc1 bias
                pl.BlockSpec((C_out, HID), lambda b, l: (0, 0)), # fc2 W (masked)
                pl.BlockSpec((C_out, 1), lambda b, l: (0, 0)),   # fc2 bias
            ],
            out_specs=[
                pl.BlockSpec((None, C_out, TL), lambda b, l: (b, 0, l)),  # y
                pl.BlockSpec((None, 1, TL), lambda b, l: (b, 0, l)),      # t_mask
            ],
        ),
        compiler_params=pltpu.CompilerParams(
            # Both grid axes are independent -> shardable across TensorCores.
            dimension_semantics=("parallel", "parallel"),
            vmem_limit_bytes=vmem_limit,
        ),
    )(x3, gthc, w1m, b1c, w2m, b2c)

    y = y_p[:, :, :L].reshape(B, C_out, H, W)
    t_mask = tmask_p[:, :, :L].reshape(B, L, 1)        # free: last dim is 1
    return y, t_mask, (c_mask1.mean().reshape(1), c_mask2.mean().reshape(1))


def _reference(x, w1, b1, th1, w2, b2, th2, gate_th):
    """Pure-JAX mirror of PyTorch Mlp2.forward (exact-erf GELU, dropout=id)."""
    B, C, H, W = x.shape
    C_out = w2.shape[0]
    xt = x.reshape(B, C, H * W).transpose(0, 2, 1).astype(jnp.float32)   # (B,L,C)
    g = (jnp.abs(xt) - gate_th.reshape(1, 1, C)).mean(axis=2, keepdims=True)
    t_mask = (g > 0.0).astype(jnp.float32)
    xt = xt * t_mask
    cm1 = ((jnp.abs(w1) - th1).mean(axis=0) > 0.0).astype(jnp.float32)
    h = xt @ (w1 * cm1[None, :]).T + b1
    h = jax.nn.gelu(h, approximate=False)      # PyTorch nn.GELU() default (erf)
    h = h * t_mask
    cm2 = ((jnp.abs(w2) - th2).mean(axis=0) > 0.0).astype(jnp.float32)
    y = h @ (w2 * cm2[None, :]).T + b2
    y = y.transpose(0, 2, 1).reshape(B, C_out, H, W).astype(x.dtype)
    return y, t_mask, (cm1.mean().reshape(1), cm2.mean().reshape(1))


if __name__ == "__main__":
    key = jax.random.PRNGKey(0)
    B, C, H, W = 2, 4, 16, 16
    HID = 32
    k1, k2, k3, k4, k5 = jax.random.split(key, 5)

    x = jax.random.normal(k1, (B, C, H, W), dtype=jnp.float32)
    w1 = jax.random.normal(k2, (HID, C), dtype=jnp.float32) * 0.02
    b1 = jax.random.normal(k3, (HID,), dtype=jnp.float32) * 0.01
    w2 = jax.random.normal(k4, (C, HID), dtype=jnp.float32) * 0.02
    b2 = jax.random.normal(k5, (C,), dtype=jnp.float32) * 0.01
    # Non-zero thresholds so both the channel masks and the token gate
    # actually prune something (the module inits them to 0, which is a no-op).
    th1 = jnp.full((HID, 1), 0.015, dtype=jnp.float32)
    th2 = jnp.full((C, 1), 0.015, dtype=jnp.float32)
    gate_th = jnp.full((1, 1, C), 0.8, dtype=jnp.float32)

    y, t_mask, (cm1_mean, cm2_mean) = mlp2_forward(
        x, w1, b1, th1, w2, b2, th2, gate_th)
    jax.block_until_ready(y)

    y_ref, t_mask_ref, (cm1_ref, cm2_ref) = _reference(
        x, w1, b1, th1, w2, b2, th2, gate_th)

    assert y.shape == (B, C, H, W) and y.dtype == x.dtype
    assert t_mask.shape == (B, H * W, 1)
    assert jnp.array_equal(t_mask, t_mask_ref), "token-mask mismatch"
    assert jnp.allclose(y, y_ref, atol=1e-4, rtol=1e-4), "output mismatch vs reference"
    assert jnp.allclose(cm1_mean, cm1_ref) and jnp.allclose(cm2_mean, cm2_ref)

    print("KERNEL_OK")
</pallas_src>

<mosaic_0001>
module attributes {stable_mosaic.version = 11 : i64} {
  func.func @_mlp2_kernel(%arg0: i32, %arg1: i32, %arg2: memref<1x4x256xf32, #tpu.memory_space<vmem>>, %arg3: memref<4x1xf32, #tpu.memory_space<vmem>>, %arg4: memref<32x4xf32, #tpu.memory_space<vmem>>, %arg5: memref<32x1xf32, #tpu.memory_space<vmem>>, %arg6: memref<4x32xf32, #tpu.memory_space<vmem>>, %arg7: memref<4x1xf32, #tpu.memory_space<vmem>>, %arg8: memref<1x4x256xf32, #tpu.memory_space<vmem>>, %arg9: memref<1x1x256xf32, #tpu.memory_space<vmem>>) attributes {dimension_semantics = [#tpu.dimension_semantics<parallel>, #tpu.dimension_semantics<parallel>], iteration_bounds = array<i64: 2, 1>, scalar_prefetch = 0 : i64, scratch_operands = 0 : i64, tpu.core_type = #tpu.core_type<tc>, window_params = [{transform_indices = @transform_0, window_bounds = array<i64: 1, 4, 256>}, {pipeline_mode = #tpu.pipeline_mode<synchronous>, transform_indices = @transform_1, window_bounds = array<i64: 4, 1>}, {pipeline_mode = #tpu.pipeline_mode<synchronous>, transform_indices = @transform_2, window_bounds = array<i64: 32, 4>}, {pipeline_mode = #tpu.pipeline_mode<synchronous>, transform_indices = @transform_3, window_bounds = array<i64: 32, 1>}, {pipeline_mode = #tpu.pipeline_mode<synchronous>, transform_indices = @transform_4, window_bounds = array<i64: 4, 32>}, {pipeline_mode = #tpu.pipeline_mode<synchronous>, transform_indices = @transform_5, window_bounds = array<i64: 4, 1>}, {transform_indices = @transform_6, window_bounds = array<i64: 1, 4, 256>}, {transform_indices = @transform_7, window_bounds = array<i64: 1, 1, 256>}]} {
    %c0 = arith.constant 0 : index
    %c0_0 = arith.constant 0 : index
    %c0_1 = arith.constant 0 : index
    %0 = vector.load %arg2[%c0, %c0_0, %c0_1] : memref<1x4x256xf32, #tpu.memory_space<vmem>>, vector<1x4x256xf32>
    %1 = vector.shape_cast %0 : vector<1x4x256xf32> to vector<4x256xf32>
    %2 = math.absf %1 : vector<4x256xf32>
    %c0_2 = arith.constant 0 : index
    %c0_3 = arith.constant 0 : index
    %3 = vector.load %arg3[%c0_2, %c0_3] : memref<4x1xf32, #tpu.memory_space<vmem>>, vector<4x1xf32>
    %4 = vector.broadcast %3 : vector<4x1xf32> to vector<4x256xf32>
    %5 = arith.subf %2, %4 : vector<4x256xf32>
    %cst = arith.constant dense<0.000000e+00> : vector<256xf32>
    %6 = vector.multi_reduction <add>, %5, %cst [0] : vector<4x256xf32> to vector<256xf32>
    %7 = vector.shape_cast %6 : vector<256xf32> to vector<1x256xf32>
    %cst_4 = arith.constant 0.000000e+00 : f32
    %8 = vector.broadcast %cst_4 : f32 to vector<1x256xf32>
    %9 = arith.cmpf ogt, %7, %8 : vector<1x256xf32>
    %10 = arith.extui %9 : vector<1x256xi1> to vector<1x256xi32>
    %11 = arith.sitofp %10 : vector<1x256xi32> to vector<1x256xf32>
    %12 = vector.broadcast %11 : vector<1x256xf32> to vector<4x256xf32>
    %13 = arith.mulf %1, %12 : vector<4x256xf32>
    %c0_5 = arith.constant 0 : index
    %c0_6 = arith.constant 0 : index
    %14 = vector.load %arg4[%c0_5, %c0_6] : memref<32x4xf32, #tpu.memory_space<vmem>>, vector<32x4xf32>
    %cst_7 = arith.constant dense<0.000000e+00> : vector<32x256xf32>
    %15 = tpu.matmul %14, %13, %cst_7 {dimension_numbers = #tpu.dot_dimension_numbers<[1], [0], [0], [1], [0, 0, 1, 1], [], []>} : vector<32x4xf32>, vector<4x256xf32>, vector<32x256xf32> -> vector<32x256xf32>
    %c0_8 = arith.constant 0 : index
    %c0_9 = arith.constant 0 : index
    %16 = vector.load %arg5[%c0_8, %c0_9] : memref<32x1xf32, #tpu.memory_space<vmem>>, vector<32x1xf32>
    %17 = vector.broadcast %16 : vector<32x1xf32> to vector<32x256xf32>
    %18 = arith.addf %15, %17 : vector<32x256xf32>
    %cst_10 = arith.constant 5.000000e-01 : f32
    %19 = vector.broadcast %cst_10 : f32 to vector<32x256xf32>
    %20 = arith.mulf %19, %18 : vector<32x256xf32>
    %cst_11 = arith.constant 0.707106769 : f32
    %21 = vector.broadcast %cst_11 : f32 to vector<32x256xf32>
    %22 = arith.mulf %18, %21 : vector<32x256xf32>
    %23 = math.absf %22 : vector<32x256xf32>
    %cst_12 = arith.constant 0.327591091 : f32
    %24 = vector.broadcast %cst_12 : f32 to vector<32x256xf32>
    %25 = arith.mulf %24, %23 : vector<32x256xf32>
    %cst_13 = arith.constant 1.000000e+00 : f32
    %26 = vector.broadcast %cst_13 : f32 to vector<32x256xf32>
    %27 = arith.addf %26, %25 : vector<32x256xf32>
    %cst_14 = arith.constant 1.000000e+00 : f32
    %28 = vector.broadcast %cst_14 : f32 to vector<32x256xf32>
    %29 = arith.divf %28, %27 : vector<32x256xf32>
    %cst_15 = arith.constant 1.06140542 : f32
    %30 = vector.broadcast %cst_15 : f32 to vector<32x256xf32>
    %31 = arith.mulf %30, %29 : vector<32x256xf32>
    %cst_16 = arith.constant -1.45315206 : f32
    %32 = vector.broadcast %cst_16 : f32 to vector<32x256xf32>
    %33 = arith.addf %31, %32 : vector<32x256xf32>
    %34 = arith.mulf %33, %29 : vector<32x256xf32>
    %cst_17 = arith.constant 1.42141378 : f32
    %35 = vector.broadcast %cst_17 : f32 to vector<32x256xf32>
    %36 = arith.addf %34, %35 : vector<32x256xf32>
    %37 = arith.mulf %36, %29 : vector<32x256xf32>
    %cst_18 = arith.constant -0.284496725 : f32
    %38 = vector.broadcast %cst_18 : f32 to vector<32x256xf32>
    %39 = arith.addf %37, %38 : vector<32x256xf32>
    %40 = arith.mulf %39, %29 : vector<32x256xf32>
    %cst_19 = arith.constant 0.254829586 : f32
    %41 = vector.broadcast %cst_19 : f32 to vector<32x256xf32>
    %42 = arith.addf %40, %41 : vector<32x256xf32>
    %43 = arith.mulf %42, %29 : vector<32x256xf32>
    %cst_20 = arith.constant 0.000000e+00 : f32
    %44 = vector.broadcast %cst_20 : f32 to vector<32x256xf32>
    %45 = arith.subf %44, %23 : vector<32x256xf32>
    %46 = arith.mulf %45, %23 : vector<32x256xf32>
    %47 = math.exp %46 : vector<32x256xf32>
    %48 = arith.mulf %43, %47 : vector<32x256xf32>
    %cst_21 = arith.constant 1.000000e+00 : f32
    %49 = vector.broadcast %cst_21 : f32 to vector<32x256xf32>
    %50 = arith.subf %49, %48 : vector<32x256xf32>
    %cst_22 = arith.constant 0.000000e+00 : f32
    %51 = vector.broadcast %cst_22 : f32 to vector<32x256xf32>
    %52 = arith.cmpf olt, %22, %51 : vector<32x256xf32>
    %cst_23 = arith.constant 0.000000e+00 : f32
    %53 = vector.broadcast %cst_23 : f32 to vector<32x256xf32>
    %54 = arith.subf %53, %50 : vector<32x256xf32>
    %55 = arith.select %52, %54, %50 : vector<32x256xi1>, vector<32x256xf32>
    %cst_24 = arith.constant 1.000000e+00 : f32
    %56 = vector.broadcast %cst_24 : f32 to vector<32x256xf32>
    %57 = arith.addf %56, %55 : vector<32x256xf32>
    %58 = arith.mulf %20, %57 : vector<32x256xf32>
    %59 = vector.broadcast %11 : vector<1x256xf32> to vector<32x256xf32>
    %60 = arith.mulf %58, %59 : vector<32x256xf32>
    %c0_25 = arith.constant 0 : index
    %c0_26 = arith.constant 0 : index
    %61 = vector.load %arg6[%c0_25, %c0_26] : memref<4x32xf32, #tpu.memory_space<vmem>>, vector<4x32xf32>
    %cst_27 = arith.constant dense<0.000000e+00> : vector<4x256xf32>
    %62 = tpu.matmul %61, %60, %cst_27 {dimension_numbers = #tpu.dot_dimension_numbers<[1], [0], [0], [1], [0, 0, 1, 1], [], []>} : vector<4x32xf32>, vector<32x256xf32>, vector<4x256xf32> -> vector<4x256xf32>
    %c0_28 = arith.constant 0 : index
    %c0_29 = arith.constant 0 : index
    %63 = vector.load %arg7[%c0_28, %c0_29] : memref<4x1xf32, #tpu.memory_space<vmem>>, vector<4x1xf32>
    %64 = vector.broadcast %63 : vector<4x1xf32> to vector<4x256xf32>
    %65 = arith.addf %62, %64 : vector<4x256xf32>
    %c0_30 = arith.constant 0 : index
    %c0_31 = arith.constant 0 : index
    %c0_32 = arith.constant 0 : index
    %66 = vector.load %arg8[%c0_30, %c0_31, %c0_32] : memref<1x4x256xf32, #tpu.memory_space<vmem>>, vector<1x4x256xf32>
    %67 = vector.shape_cast %66 : vector<1x4x256xf32> to vector<4x256xf32>
    %68 = vector.shape_cast %65 : vector<4x256xf32> to vector<1x4x256xf32>
    tpu.vector_store %arg8[%c0_30, %c0_31, %c0_32], %68 {strides = array<i32>} : memref<1x4x256xf32, #tpu.memory_space<vmem>>, vector<1x4x256xf32>,
    %c0_33 = arith.constant 0 : index
    %c0_34 = arith.constant 0 : index
    %c0_35 = arith.constant 0 : index
    %69 = vector.load %arg9[%c0_33, %c0_34, %c0_35] : memref<1x1x256xf32, #tpu.memory_space<vmem>>, vector<1x1x256xf32>
    %70 = vector.shape_cast %69 : vector<1x1x256xf32> to vector<1x256xf32>
    %71 = vector.shape_cast %11 : vector<1x256xf32> to vector<1x1x256xf32>
    tpu.vector_store %arg9[%c0_33, %c0_34, %c0_35], %71 {strides = array<i32>} : memref<1x1x256xf32, #tpu.memory_space<vmem>>, vector<1x1x256xf32>,
    return
  }
  func.func @transform_0(%arg0: i32, %arg1: i32) -> (i32, i32, i32) {
    %c0_i32 = arith.constant 0 : i32
    %c0_i32_0 = arith.constant 0 : i32
    return %arg0, %c0_i32, %arg1 : i32, i32, i32
  }
  func.func @transform_1(%arg0: i32, %arg1: i32) -> (i32, i32) {
    %c0_i32 = arith.constant 0 : i32
    %c0_i32_0 = arith.constant 0 : i32
    %c0_i32_1 = arith.constant 0 : i32
    return %c0_i32, %c0_i32_0 : i32, i32
  }
  func.func @transform_2(%arg0: i32, %arg1: i32) -> (i32, i32) {
    %c0_i32 = arith.constant 0 : i32
    %c0_i32_0 = arith.constant 0 : i32
    %c0_i32_1 = arith.constant 0 : i32
    return %c0_i32, %c0_i32_0 : i32, i32
  }
  func.func @transform_3(%arg0: i32, %arg1: i32) -> (i32, i32) {
    %c0_i32 = arith.constant 0 : i32
    %c0_i32_0 = arith.constant 0 : i32
    %c0_i32_1 = arith.constant 0 : i32
    return %c0_i32, %c0_i32_0 : i32, i32
  }
  func.func @transform_4(%arg0: i32, %arg1: i32) -> (i32, i32) {
    %c0_i32 = arith.constant 0 : i32
    %c0_i32_0 = arith.constant 0 : i32
    %c0_i32_1 = arith.constant 0 : i32
    return %c0_i32, %c0_i32_0 : i32, i32
  }
  func.func @transform_5(%arg0: i32, %arg1: i32) -> (i32, i32) {
    %c0_i32 = arith.constant 0 : i32
    %c0_i32_0 = arith.constant 0 : i32
    %c0_i32_1 = arith.constant 0 : i32
    return %c0_i32, %c0_i32_0 : i32, i32
  }
  func.func @transform_6(%arg0: i32, %arg1: i32) -> (i32, i32, i32) {
    %c0_i32 = arith.constant 0 : i32
    %c0_i32_0 = arith.constant 0 : i32
    return %arg0, %c0_i32, %arg1 : i32, i32, i32
  }
  func.func @transform_7(%arg0: i32, %arg1: i32) -> (i32, i32, i32) {
    %c0_i32 = arith.constant 0 : i32
    %c0_i32_0 = arith.constant 0 : i32
    return %arg0, %c0_i32, %arg1 : i32, i32, i32
  }
}

</mosaic_0001>

<bundles_post_ra>
// kernel: tpu_custom_call.1
= control target key start
LH: loop header
LB: loop body
LE: loop exit
PB: predicated region body
PF: predicated region fallthrough
CT: control target
= control target key end

     0   :  { %s1851_s0 = inlined_call_operand.vmem [shape: f32[2,4,256], index: 0, kind: input, shape index: {}]   ;;  %s1852_s1 = inlined_call_operand.vmem [shape: f32[4,1], index: 1, kind: input, shape index: {}]   ;;  %s1853_s2 = inlined_call_operand.vmem [shape: f32[32,4], index: 2, kind: input, shape index: {}]   ;;  %s1854_s3 = inlined_call_operand.vmem [shape: f32[32,1], index: 3, kind: input, shape index: {}]   ;;  %s1855_s4 = inlined_call_operand.vmem [shape: f32[4,32], index: 4, kind: input, shape index: {}]   ;;  %s1856_s5 = inlined_call_operand.vmem [shape: f32[4,1], index: 5, kind: input, shape index: {}]   ;;  %s1857_s6 = inlined_call_operand.hbm [shape: f32[2,4,256], index: 6, kind: output, shape index: {0}]   ;;  %s1858_s7 = inlined_call_operand.hbm [shape: f32[2,1,256], index: 7, kind: output, shape index: {1}]  }
   0x1   :  { %1859 = sst [smem:[#allocation8_spill]] %s1851_s0 }
   0x2   :  { %1860 = sst [smem:[#allocation9_spill]] %s1852_s1 }
   0x3   :  { %13 = vsyncpa [#allocation3], 0 }
   0x4   :  { %15 = vsyncpa [#allocation3 + $0x1], 0 }
   0x5   :  { %16 = vsyncpa [#allocation5], 0 }
   0x6   :  { %18 = vsyncpa [#allocation5 + $0x1], 0  ;;  %s1307_s24 = smov 0   ;;  %s1309_s25 = smov 0  }
   0x7   :  { %s1311_s26 = smov 0   ;;  %s1313_s27 = smov 0  }
   0x8   :  { %s1315_s28 = smov 0   ;;  %s1317_s29 = smov 0  }
   0x9 LB: > { %s1020_s30 = sadd.s32 4294967295, %s1262_s29   ;;  %s1021_s8 = sadd.s32 4294967294, %s1262_s29   ;;  %s1262_s29 = sphi %s1317_s29, %s24_s29   ;;  %s1258_s28 = sphi %s1315_s28, %s1883_s28   ;;  %s1254_s27 = sphi %s1313_s27, %s1882_s27   ;;  %s1250_s26 = sphi %s1311_s26, %s1881_s26   ;;  %s1246_s25 = sphi %s1309_s25, %s1880_s25   ;;  %s1242_s24 = sphi %s1307_s24, %s1879_s24  }
   0xa   : > { %s36_s9 = sadd.s32 1, %s1258_s28  ;;  %s178_s10 = sadd.s32 1, %s1250_s26 }
   0xb   : > { %p38_p0 = scmp.ge.s32.totalorder %s36_s9, 2  ;;  %p188_p1 = scmp.ne.s32.totalorder %s1250_s26, %s1246_s25 }
   0xc   : > { %p189_p2 = scmp.eq.s32.totalorder %s1020_s30, 1  ;;  %p194_p3 = scmp.ne.s32.totalorder %s1246_s25, %s1242_s24 }
   0xd   : > { %s1885_s9 = smov (%p38_p0, %s36_s9), 0  ;;  %p195_p5 = scmp.eq.s32.totalorder %s1021_s8, 1 }
   0xe   : > { %p1347_p4 = por %p189_p2, %p188_p1  ;;  %s173_s12 = ssub.s32 %s1258_s28, %s1885_s9 }
   0xf   : > { %p1024_p6 = scmp.ge.s32.totalorder %s1262_s29, 1  ;;  %p176_p7 = scmp.eq.s32.totalorder %s173_s12, 0 }
  0x10   : > { %p1354_p8 = por %p195_p5, %p194_p3  ;;  %p269_p9 = scmp.lt.s32.totalorder %s1262_s29, 3 }
  0x11   : > { %s1360_s14 = scalar_select %p176_p7, %s1250_s26, %s178_s10  }
  0x12   : > { %p270_p10 = pnand %p1024_p6, %p269_p9 }
  0x13   : > { %s1863_s1 = sld [smem:[#allocation9_spill]] (!%p270_p10)  ;;  %p311_p11 = scmp.lt.s32.totalorder (!%p270_p10), %s1254_s27, 1 }
  0x14   : > { %273 = sbr.rel (%p270_p10) target bundleno = 549 (0x225), region = 44  ;;  %s1864_s0 = sld [smem:[#allocation8_spill]] (!%p270_p10) }
  0x19   : > { %v324_v0 = vld [vmem:[%s1863_s1] sm:$0xf]  ;;  %v1264_v1 = vmov 0   ;;  %v375_v2 = vld [vmem:[%s1854_s3 + $0x18] sm:$0xff]  ;;  %s312_s19 = scalar_select %p311_p11, %s1254_s27, 1  ;;  %vm341_vm0 = vcmask 1043456   ;;  %v864_v43 = vlaneseq }
  0x1a   : > { %1117 = vset.pattern.permute.xlu0 %v1264_v1  ;;  %1118 = vset.pattern.permute.xlu1 %v1264_v1  ;;  %v1265_v3 = vmov 839922192   ;;  %v374_v23 = vld [vmem:[%s1854_s3 + $0x10] sm:$0xff]  ;;  %v1266_v28 = vmov 0.0   ;;  %v373_v31 = vld [vmem:[%s1854_s3 + $0x8] sm:$0xff]  ;;  %v372_v32 = vld [vmem:[%s1854_s3] sm:$0xff] }
  0x1b   : > { %327 = vperm.xlu0 %1117, %v324_v0   ;;  %1119 = vset.pattern.permute.xlu2 %v1264_v1  ;;  %s1050_s20 = sshll.u32 %s312_s19, 3  ;;  %v330_v4 = vunpack.c.l.s4 %v1265_v3  ;;  %v804_v36 = vld [vmem:[%s1856_s5] sm:$0xf]  ;;  %vm400_vm3 = vcmask 31744   ;;  %v371_v38 = vld [vmem:[%s1853_s2 + $0x18] sm:$0xff]  ;;  %v369_v41 = vld [vmem:[%s1853_s2 + $0x8] sm:$0xff] }
  0x1c   : > { %s318_s23 = scalar_lea.vmem %s1864_s0, %s1050_s20  ;;  %388 = vperm.xlu1 %1118, %v374_v23   ;;  %378 = vperm.xlu2 %1119, %v372_v32   ;;  %v368_v37 = vld [vmem:[%s1853_s2] sm:$0xff]  ;;  %vm861_vm4 = vcmask 1040384   ;;  %vm866_vm5 = vcmp.lt.s32.totalorder %v864_v43, 256  ;;  %v370_v45 = vld [vmem:[%s1853_s2 + $0x10] sm:$0xff]  ;;  %s1047_s19 = sshll.u32 %s1254_s27, 1 }
  0x1d   : > { %v322_v5 = vld [vmem:[%s318_s23] sm:$0xff]  ;;  %v331_v6 = vunpack.c.0.s8 %v330_v4  ;;  %s1407_s23 = sand.u32 1, %s1246_s25   ;;  %s1172_s0 = scalar_lea.hbm %s1858_s7, 4 }
  0x1e   : > { %v323_v7 = vand.u32 2147483647, %v322_v5  ;;  %s1026_s30 = sshll.u32 %s1407_s23, 1  ;;  %s875_s10 = scalar_lea.sflag [#allocation5], %s1407_s23 }
  0x1f   : > { %s1419_s12 = scalar_lea.vmem [#allocation4], %s1026_s30  ;;  %s904_s30 = scalar_lea.hbm %s1858_s7, %s1047_s19 }
  0x20   : > { %s906_s20 = sshll.u32 %s1419_s12, 4  ;;  %s908_s8 = sshll.u32 %s904_s30, 4  ;;  %s907_s20 = int_to_ptr.vmem [resolvable:$true] %s906_s20  ;;  %s909_s8 = int_to_ptr.hbm [resolvable:$true] %s908_s8 }
  0x21   : > { %s1166_s15 = sshra.s32 %s909_s8, 4  ;;  %s1167_s15 = int_to_ptr.hbm [resolvable:$true] %s1166_s15 }
  0x22   : > { %s1168_s16 = scalar_lea.hbm %s1167_s15, 2  ;;  %p1173_p1 = scmp.lt.s32.totalorder %s1167_s15, %s1858_s7 }
  0x23   : > { %393 = vperm.xlu0 %1117, %v375_v2   ;;  %p1169_p12 = scmp.ne.s32.totalorder %s1167_s15, %s1168_s16  ;;  %p1174_p2 = scmp.lt.s32.totalorder %s1172_s0, %s1168_s16 }
  0x24   : > { %383 = vperm.xlu1 %1118, %v373_v31   ;;  %807 = vperm.xlu2 %1119, %v804_v36  }
  0x25   : > { %p1170_p13 = pnand %p1169_p12, %p1347_p4  ;;  %p1175_p3 = por %p1174_p2, %p1173_p1 }
  0x27   : > { %p1171_p0 = pneg %p1170_p13 }
  0x29   : > { %p1176_p5 = pnand %p1175_p3, %p1171_p0 }
  0x76   : > { %v379_v46 = vpop.permute.xlu2 %378 }
  0x8d   : > { %v328_v8 = vpop.permute.xlu0 %327 }
  0x8e   : > { %v332_v9 = vperm.slane %v328_v8, %v331_v6  ;;  %v1429_v50 = vpop.permute.xlu1 %388 }
  0x90   : > { %v334_v10 = vsub.f32 %v323_v7, %v332_v9 }
  0x92   : > { %336 = vst [vmem:[#allocation1] ss:$2 sm:$0xff] %v334_v10 }
  0x95   : > { %v394_v55 = vpop.permute.xlu0 %393 }
  0x96   : > { %v384_v4 = vpop.permute.xlu1 %383 }
  0x99   : > { %v337_v11 = vld.sshfl [vmem:[#allocation1] sm:$0xff pattern:$0x75316420]  ;;  %v338_v12 = vld.sshfl [vmem:[#allocation1 + $0x8] sm:$0xff pattern:$0x75316420] }
  0x9a   : > { %v342_v13 = vsel %vm341_vm0, %v337_v11, 0.0  ;;  %v349_v14 = vsel %vm341_vm0, %v338_v12, 0.0 }
  0x9b   : > { %v343_v15 = vrot.slane %v342_v13, 4  ;;  %v350_v16 = vrot.slane %v349_v14, 4 }
  0x9d   : > { %v344_v17 = vadd.f32 %v343_v15, %v342_v13  ;;  %v351_v18 = vadd.f32 %v350_v16, %v349_v14 }
  0x9f   : > { %v345_v19 = vrot.slane %v344_v17, 2  ;;  %v352_v20 = vrot.slane %v351_v18, 2 }
  0xa1   : > { %v346_v21 = vadd.f32 %v345_v19, %v344_v17  ;;  %v353_v22 = vadd.f32 %v352_v20, %v351_v18 }
  0xa3   : > { %v347_v24 = vrot.slane %v346_v21, 1  ;;  %v354_v25 = vrot.slane %v353_v22, 1 }
  0xa5   : > { %v348_v26 = vadd.f32 %v347_v24, %v346_v21  ;;  %v355_v27 = vadd.f32 %v354_v25, %v353_v22 }
  0xa7   : > { %vm356_vm1 = vcmp.gt.f32.partialorder %v348_v26, 0.0  ;;  %vm357_vm2 = vcmp.gt.f32.partialorder %v355_v27, 0.0 }
  0xa8   : > { %v1378_v29 = vsel %vm357_vm2, 1.0, %v1266_v28  ;;  %v1387_v33 = vsel %vm356_vm1, 1.0, %v1266_v28 }
  0xa9   : > { %v364_v30 = vrot.slane %v1378_v29, 4  ;;  %v860_v42 = vrot.slane %v1378_v29, 7 }
  0xab   : > { %v365_v34 = vsel %vm341_vm0, %v1387_v33, %v364_v30  ;;  %v862_v44 = vsel %vm861_vm4, %v1387_v33, %v860_v42 }
  0xac   : > { %v367_v35 = vmul.f32 %v365_v34, %v322_v5  ;;  %868 = vst.msk [vmem:[%s1419_s12] sm:$0x3] %vm866_vm5, %v862_v44 }
  0xae   : > { %397 = vst [vmem:[#allocation1] ss:$2 sm:$0xff] %v367_v35 }
  0xb5   : > { %v398_v39 = vld.sshfl [vmem:[#allocation1] sm:$0xff pattern:$0x75316420]  ;;  %v399_v40 = vld.sshfl [vmem:[#allocation1 + $0x8] sm:$0xff pattern:$0x75316420] }
  0xb6   : > { %1031 = vmatpush.msk.msra.mxu0 %vm341_vm0, %v398_v39  ;;  %1052 = vmatpush.msk.msra.mxu2 %vm341_vm0, %v398_v39 }
  0xb7   : > { %1036 = vmatpush.msk.msra.mxu1 %vm341_vm0, %v399_v40  ;;  %1053 = vmatpush.msk.msra.mxu3 %vm341_vm0, %v399_v40 }
  0xb8   : > { %1032 = vmatmul.msk.f32.vlgmr.msra.gmra.mxu0 %vm400_vm3, %v368_v37  ;;  %1035 = vmatmul.msk.f32.vlgmr.msra.gmra.mxu2 %vm400_vm3, %v371_v38 }
  0xb9   : > { %1037 = vmatmul.msk.f32.vlgmr.msra.gmra.mxu1 %vm400_vm3, %v368_v37  ;;  %1040 = vmatmul.msk.f32.vlgmr.msra.gmra.mxu3 %vm400_vm3, %v371_v38 }
  0xc0   : > { %1033 = vmatmul.msk.f32.gmra.mxu0 %vm400_vm3, %v369_v41 }
  0xc1   : > { %1038 = vmatmul.msk.f32.gmra.mxu1 %vm400_vm3, %v369_v41 }
  0xc8   : > { %1034 = vmatmul.msk.f32.gmra.mxu0 %vm400_vm3, %v370_v45 }
  0xc9   : > { %1039 = vmatmul.msk.f32.gmra.mxu1 %vm400_vm3, %v370_v45 }
 0x135   : > { %v434_v47 = vpop.f32.mrf.mxu0 }
 0x136   : > { %v1427_v48 = vadd.f32 %v434_v47, %v379_v46  ;;  %v463_v49 = vpop.f32.mrf.mxu1 }
 0x137   : > { %v1431_v51 = vadd.f32 %v463_v49, %v379_v46 }
 0x138   : > { %v1434_v52 = vmul.f32 0.70710677, %v1427_v48 }
 0x139   : > { %v1437_v53 = vmul.f32 0.70710677, %v1431_v51 }
 0x13a   : > { %v491_v54 = vand.u32 2147483647, %v1434_v52 }
 0x13b   : > { %v492_v56 = vand.u32 2147483647, %v1437_v53  ;;  %v443_v57 = vpop.f32.mrf.mxu2 }
 0x13c   : > { %v499_v58 = vmul.f32 0.3275911, %v491_v54  ;;  %v444_v59 = vadd.f32 %v443_v57, %v394_v55  ;;  %v472_v60 = vpop.f32.mrf.mxu3  ;;  %v707_v3 = vsub.f32 0.0, %v491_v54 }
 0x13d   : > { %v500_v61 = vmul.f32 0.3275911, %v492_v56  ;;  %v473_v62 = vadd.f32 %v472_v60, %v394_v55  ;;  %v437_v5 = vpop.f32.mrf.mxu0  ;;  %v708_v19 = vsub.f32 0.0, %v492_v56 }
 0x13e   : > { %v1441_v63 = vadd.f32 1.0, %v499_v58  ;;  %v1443_v0 = vmul.f32 0.70710677, %v444_v59  ;;  %v715_v8 = vmul.f32 %v707_v3, %v491_v54  ;;  %v1453_v11 = vadd.f32 %v437_v5, %v384_v4  ;;  %v466_v12 = vpop.f32.mrf.mxu1 }
 0x13f   : > { %v1445_v1 = vadd.f32 1.0, %v500_v61  ;;  %v1447_v2 = vmul.f32 0.70710677, %v473_v62  ;;  %v1473_v26 = vadd.f32 %v466_v12, %v384_v4  ;;  %v1476_v28 = vmul.f32 0.5, %v444_v59 }
 0x140   : > { %1120 = vrcp.f32 %v1441_v63  ;;  %v497_v6 = vand.u32 2147483647, %v1443_v0  ;;  %v1466_v21 = vmul.f32 0.70710677, %v1453_v11  ;;  %v526_v22 = vand.u32 2147483648, %v1441_v63 }
 0x141   : > { %1122 = vrcp.f32 %v1445_v1  ;;  %v498_v7 = vand.u32 2147483647, %v1447_v2  ;;  %v723_v23 = vmul.f32 1.442695, %v715_v8  ;;  %v541_v27 = vand.u32 2147483648, %v1445_v1 }
 0x142   : > { %v505_v9 = vmul.f32 0.3275911, %v497_v6  ;;  %v713_v10 = vsub.f32 0.0, %v497_v6  ;;  %v1478_v32 = vmul.f32 %v708_v19, %v492_v56  ;;  %v1480_v34 = vmul.f32 0.5, %v473_v62 }
 0x143   : > { %v506_v13 = vmul.f32 0.3275911, %v498_v7  ;;  %v714_v16 = vsub.f32 0.0, %v498_v7  ;;  %v493_v35 = vand.u32 2147483647, %v1466_v21  ;;  %v1483_v36 = vor.u32 1.1754944e-38, %v526_v22 }
 0x144   : > { %v1457_v15 = vadd.f32 1.0, %v505_v9  ;;  %v721_v24 = vmul.f32 %v713_v10, %v497_v6  ;;  %v1487_v43 = vmul.f32 0.70710677, %v1473_v26  ;;  %v1491_v45 = vor.u32 1.1754944e-38, %v541_v27 }
 0x145   : > { %v1463_v20 = vadd.f32 1.0, %v506_v13  ;;  %v722_v30 = vmul.f32 %v714_v16, %v498_v7  ;;  %v440_v39 = vpop.f32.mrf.mxu0  ;;  %v501_v41 = vmul.f32 0.3275911, %v493_v35  ;;  %v709_v42 = vsub.f32 0.0, %v493_v35 }
 0x146   : > { %v1455_v14 = vpop.eup %1120  ;;  %1124 = vrcp.f32 %v1457_v15  ;;  %v616_v37 = vand.u32 2147483648, %v1457_v15  ;;  %v735_v38 = vmul.f32 1.442695, %v721_v24  ;;  %v469_v49 = vpop.f32.mrf.mxu1  ;;  %v524_v54 = vand.u32 2147483647, %v1441_v63 }
 0x147   : > { %v1459_v17 = vpop.eup %1122  ;;  %v516_v18 = vmul.f32 %v1455_v14, %v1441_v63  ;;  %1126 = vrcp.f32 %v1463_v20  ;;  %v631_v46 = vand.u32 2147483648, %v1463_v20  ;;  %v737_v47 = vmul.f32 1.442695, %v722_v30 }
 0x148   : > { %v531_v25 = vmul.f32 %v1459_v17, %v1445_v1  ;;  %1128 = vpow2.f32 %v723_v23  ;;  %v1502_v58 = vadd.f32 1.0, %v501_v41  ;;  %v1505_v59 = vadd.f32 %v440_v39, %v1429_v50 }
 0x149   : > { %v517_v31 = vsub.f32 1.0, %v516_v18  ;;  %1130 = vpow2.f32 %v735_v38  ;;  %v717_v61 = vmul.f32 %v709_v42, %v493_v35  ;;  %v494_v62 = vand.u32 2147483647, %v1487_v43 }
 0x14a   : > { %v532_v40 = vsub.f32 1.0, %v531_v25  ;;  %v1513_v4 = vor.u32 1.1754944e-38, %v616_v37  ;;  %1132 = vrcp.f32 %v1502_v58  ;;  %v1517_v5 = vadd.f32 %v469_v49, %v1429_v50 }
 0x14b   : > { %v1498_v56 = vmul.f32 %v1455_v14, %v517_v31  ;;  %vm610_vm6 = vweird.f32 %v1457_v15  ;;  %v502_v9 = vmul.f32 0.3275911, %v494_v62  ;;  %v710_v10 = vsub.f32 0.0, %v494_v62 }
 0x14c   : > { %v1489_v44 = vpop.eup %1124  ;;  %v1511_v3 = vmul.f32 %v1459_v17, %v532_v40  ;;  %v1522_v12 = vor.u32 1.1754944e-38, %v631_v46  ;;  %1134 = vpow2.f32 %v737_v47  ;;  %v1525_v13 = vmul.f32 0.70710677, %v1505_v59 }
 0x14d   : > { %v1495_v55 = vpop.eup %1126  ;;  %v606_v57 = vmul.f32 %v1489_v44, %v1457_v15  ;;  %v614_v16 = vand.u32 2147483647, %v1457_v15  ;;  %v556_v18 = vand.u32 2147483648, %v1502_v58  ;;  %v727_v50 = vmul.f32 1.442695, %v717_v61 }
 0x14e   : > { %v621_v60 = vmul.f32 %v1495_v55, %v1463_v20  ;;  %v1519_v6 = vpop.eup %1128  ;;  %v1529_v19 = vadd.f32 1.0, %v502_v9  ;;  %v718_v22 = vmul.f32 %v710_v10, %v494_v62  ;;  %vm611_vm7 = vweird.f32 %v1489_v44 }
 0x14f   : > { %v607_v7 = vsub.f32 1.0, %v606_v57  ;;  %vm625_vm8 = vweird.f32 %v1463_v20  ;;  %v495_v23 = vand.u32 2147483647, %v1525_v13  ;;  %v1535_v24 = vmul.f32 0.70710677, %v1517_v5  ;;  %v1538_v27 = vpop.eup %1130  ;;  %vm1563_vm12 = vmor %vm610_vm6, %vm611_vm7 }
 0x150   : > { %v622_v8 = vsub.f32 1.0, %v621_v60  ;;  %v629_v25 = vand.u32 2147483647, %v1463_v20  ;;  %1136 = vrcp.f32 %v1529_v19  ;;  %v729_v35 = vmul.f32 1.442695, %v718_v22  ;;  %v1543_v37 = vpop.eup %1132 }
 0x151   : > { %v608_v30 = vmul.f32 %v1489_v44, %v607_v7  ;;  %v571_v38 = vand.u32 2147483648, %v1529_v19  ;;  %v503_v39 = vmul.f32 0.3275911, %v495_v23  ;;  %v711_v40 = vsub.f32 0.0, %v495_v23 }
 0x152   : > { %v623_v31 = vmul.f32 %v1495_v55, %v622_v8  ;;  %v496_v41 = vand.u32 2147483647, %v1535_v24  ;;  %vm626_vm9 = vweird.f32 %v1495_v55  ;;  %v546_v42 = vmul.f32 %v1543_v37, %v1502_v58  ;;  %v1552_v47 = vpop.eup %1134 }
 0x153   : > { %v1550_v46 = vor.u32 1.1754944e-38, %v556_v18  ;;  %1138 = vpow2.f32 %v727_v50  ;;  %v1554_v49 = vadd.f32 1.0, %v503_v39  ;;  %v719_v57 = vmul.f32 %v711_v40, %v495_v23  ;;  %vm1591_vm2 = vmor %vm625_vm8, %vm626_vm9 }
 0x154   : > { %v504_v60 = vmul.f32 0.3275911, %v496_v41  ;;  %v712_v61 = vsub.f32 0.0, %v496_v41  ;;  %v547_v62 = vsub.f32 1.0, %v546_v42  ;;  %vm550_vm10 = vweird.f32 %v1502_v58 }
 0x155   : > { %vm551_vm11 = vweird.f32 %v1543_v37  ;;  %1140 = vpow2.f32 %v729_v35  ;;  %v609_v7 = vadd.f32 %v1489_v44, %v608_v30  ;;  %v1567_v9 = vor.u32 1.1754944e-38, %v571_v38 }
 0x156   : > { %1142 = vrcp.f32 %v1554_v49  ;;  %v586_v10 = vand.u32 2147483648, %v1554_v49  ;;  %v624_v18 = vadd.f32 %v1495_v55, %v623_v31  ;;  %v1572_v50 = vpop.eup %1136  ;;  %vm565_vm13 = vweird.f32 %v1529_v19  ;;  %vm1625_vm6 = vmor %vm550_vm10, %vm551_vm11 }
 0x157   : > { %v731_v22 = vmul.f32 1.442695, %v719_v57  ;;  %v1575_v23 = vadd.f32 1.0, %v504_v60  ;;  %v720_v15 = vmul.f32 %v712_v61, %v496_v41  ;;  %v613_v30 = vsel %vm1563_vm12, %v1489_v44, %v609_v7 }
 0x158   : > { %vm521_vm14 = vweird.f32 %v1455_v14  ;;  %v548_v35 = vmul.f32 %v1543_v37, %v547_v62  ;;  %v561_v38 = vmul.f32 %v1572_v50, %v1529_v19  ;;  %vm566_vm15 = vweird.f32 %v1572_v50 }
 0x159   : > { %vm615_vm1 = vcmp.eq.f32.partialorder %v614_v16, 8.507059e+37  ;;  %v1585_v31 = vpop.eup %1138  ;;  %v1595_v44 = vor.u32 1.1754944e-38, %v586_v10  ;;  %1144 = vrcp.f32 %v1575_v23  ;;  %v601_v40 = vand.u32 2147483648, %v1575_v23  ;;  %vm1644_vm10 = vmor %vm565_vm13, %vm566_vm15 }
 0x15a   : > { %v733_v41 = vmul.f32 1.442695, %v720_v15  ;;  %vm520_vm3 = vweird.f32 %v1441_v63  ;;  %v562_v16 = vsub.f32 1.0, %v561_v38  ;;  %v1601_v42 = vsel %vm615_vm1, %v1513_v4, %v613_v30 }
 0x15b   : > { %v628_v20 = vsel %vm1591_vm2, %v1495_v55, %v624_v18  ;;  %vm630_vm4 = vcmp.eq.f32.partialorder %v629_v25, 8.507059e+37  ;;  %v1606_v57 = vpop.eup %1140  ;;  %vm580_vm5 = vweird.f32 %v1554_v49  ;;  %1146 = vpow2.f32 %v731_v22  ;;  %vm522_vm13 = vmor %vm520_vm3, %vm521_vm14 }
 0x15c   : > { %v1609_v60 = vor.u32 1.1754944e-38, %v601_v40  ;;  %v641_v61 = vmul.f32 1.0614054, %v1601_v42  ;;  %v1613_v62 = vsel %vm630_vm4, %v1522_v12, %v628_v20  ;;  %v1143_v7 = vpop.eup %1142  ;;  %v563_v4 = vmul.f32 %v1572_v50, %v562_v16 }
 0x15d   : > { %v642_v8 = vmul.f32 1.0614054, %v1613_v62  ;;  %v584_v55 = vand.u32 2147483647, %v1554_v49  ;;  %v599_v25 = vand.u32 2147483647, %v1575_v23  ;;  %v576_v10 = vmul.f32 %v1143_v7, %v1554_v49 }
 0x15e   : > { %1148 = vpow2.f32 %v733_v41  ;;  %v649_v18 = vadd.f32 -1.4531521, %v641_v61  ;;  %v549_v22 = vadd.f32 %v1543_v37, %v548_v35  ;;  %vm581_vm7 = vweird.f32 %v1143_v7 }
 0x15f   : > { %vm595_vm8 = vweird.f32 %v1575_v23  ;;  %v650_v15 = vadd.f32 -1.4531521, %v642_v8  ;;  %vm1630_vm9 = vcmp.eq.f32.partialorder %v584_v55, 8.507059e+37  ;;  %v554_v38 = vand.u32 2147483647, %v1502_v58  ;;  %v1145_v39 = vpop.eup %1144 }
 0x160   : > { %v577_v35 = vsub.f32 1.0, %v576_v10  ;;  %v657_v40 = vmul.f32 %v649_v18, %v1601_v42  ;;  %v553_v41 = vsel %vm1625_vm6, %v1543_v37, %v549_v22  ;;  %v564_v16 = vadd.f32 %v1572_v50, %v563_v4  ;;  %vm582_vm6 = vmor %vm580_vm5, %vm581_vm7 }
 0x161   : > { %v591_v58 = vmul.f32 %v1145_v39, %v1575_v23  ;;  %vm596_vm11 = vweird.f32 %v1145_v39  ;;  %v658_v61 = vmul.f32 %v650_v15, %v1613_v62  ;;  %vm1650_vm12 = vcmp.eq.f32.partialorder %v599_v25, 8.507059e+37  ;;  %v1654_v37 = vpop.eup %1146 }
 0x162   : > { %vm555_vm1 = vcmp.eq.f32.partialorder %v554_v38, 8.507059e+37  ;;  %vm536_vm2 = vweird.f32 %v1459_v17  ;;  %v578_v4 = vmul.f32 %v1143_v7, %v577_v35  ;;  %v665_v55 = vadd.f32 1.4214138, %v657_v40  ;;  %vm597_vm3 = vmor %vm595_vm8, %vm596_vm11 }
 0x163   : > { %v1658_v10 = vsel %vm555_vm1, %v1550_v46, %v553_v41  ;;  %v568_v18 = vsel %vm1644_vm10, %v1572_v50, %v564_v16  ;;  %v592_v22 = vsub.f32 1.0, %v591_v58  ;;  %v666_v12 = vadd.f32 1.4214138, %v658_v61 }
 0x164   : > { %v637_v25 = vmul.f32 1.0614054, %v1658_v10  ;;  %v519_v15 = vadd.f32 %v1455_v14, %v1498_v56  ;;  %v1666_v38 = vpop.eup %1148  ;;  %vm535_vm15 = vweird.f32 %v1445_v1  ;;  %v673_v46 = vmul.f32 %v665_v55, %v1601_v42 }
 0x165   : > { %v579_v35 = vadd.f32 %v1143_v7, %v578_v4  ;;  %v569_v50 = vand.u32 2147483647, %v1529_v19  ;;  %vm525_vm4 = vcmp.eq.f32.partialorder %v524_v54, 8.507059e+37  ;;  %v593_v56 = vmul.f32 %v1145_v39, %v592_v22  ;;  %vm1720_vm8 = vmor %vm535_vm15, %vm536_vm2 }
 0x166   : > { %v674_v40 = vmul.f32 %v666_v12, %v1613_v62  ;;  %v645_v41 = vadd.f32 -1.4531521, %v637_v25  ;;  %v523_v16 = vsel %vm522_vm13, %v1455_v14, %v519_v15  ;;  %v681_v20 = vadd.f32 -0.28449672, %v673_v46 }
 0x167   : > { %v583_v58 = vsel %vm582_vm6, %v1143_v7, %v579_v35  ;;  %vm570_vm14 = vcmp.eq.f32.partialorder %v569_v50, 8.507059e+37  ;;  %v1683_v61 = vsel %vm525_vm4, %v1483_v36, %v523_v16  ;;  %v594_v54 = vadd.f32 %v1145_v39, %v593_v56 }
 0x168   : > { %v682_v19 = vadd.f32 -0.28449672, %v674_v40  ;;  %v1688_v63 = vsel %vm1630_vm9, %v1595_v44, %v583_v58  ;;  %v653_v49 = vmul.f32 %v645_v41, %v1658_v10  ;;  %v689_v14 = vmul.f32 %v681_v20, %v1601_v42 }
 0x169   : > { %v639_v7 = vmul.f32 1.0614054, %v1688_v63  ;;  %v1697_v36 = vsel %vm570_vm14, %v1567_v9, %v568_v18  ;;  %v635_v4 = vmul.f32 1.0614054, %v1683_v61  ;;  %v598_v44 = vsel %vm597_vm3, %v1145_v39, %v594_v54 }
 0x16a   : > { %v690_v30 = vmul.f32 %v682_v19, %v1613_v62  ;;  %v661_v55 = vadd.f32 1.4214138, %v653_v49  ;;  %v638_v22 = vmul.f32 1.0614054, %v1697_v36  ;;  %v697_v12 = vadd.f32 0.2548296, %v689_v14 }
 0x16b   : > { %v647_v25 = vadd.f32 -1.4531521, %v639_v7  ;;  %v1705_v23 = vsel %vm1650_vm12, %v1609_v60, %v598_v44  ;;  %v643_v15 = vadd.f32 -1.4531521, %v635_v4  ;;  %vm761_vm5 = vcmp.lt.f32.partialorder %v1443_v0, 0.0 }
 0x16c   : > { %v698_v9 = vadd.f32 0.2548296, %v690_v30  ;;  %v640_v18 = vmul.f32 1.0614054, %v1705_v23  ;;  %v669_v46 = vmul.f32 %v661_v55, %v1658_v10  ;;  %v646_v35 = vadd.f32 -1.4531521, %v638_v22 }
 0x16d   : > { %vm762_vm7 = vcmp.lt.f32.partialorder %v1447_v2, 0.0  ;;  %v705_v39 = vmul.f32 %v697_v12, %v1601_v42  ;;  %v655_v50 = vmul.f32 %v647_v25, %v1688_v63  ;;  %v651_v56 = vmul.f32 %v643_v15, %v1683_v61 }
 0x16e   : > { %v534_v60 = vadd.f32 %v1459_v17, %v1511_v3  ;;  %v706_v40 = vmul.f32 %v698_v9, %v1613_v62  ;;  %v648_v41 = vadd.f32 -1.4531521, %v640_v18  ;;  %v677_v16 = vadd.f32 -0.28449672, %v669_v46 }
 0x16f   : > { %v654_v42 = vmul.f32 %v646_v35, %v1697_v36  ;;  %v745_v20 = vmul.f32 %v1538_v27, %v705_v39  ;;  %v663_v58 = vadd.f32 1.4214138, %v655_v50  ;;  %v659_v19 = vadd.f32 1.4214138, %v651_v56 }
 0x170   : > { %v538_v3 = vsel %vm1720_vm8, %v1459_v17, %v534_v60  ;;  %v746_v54 = vmul.f32 %v1552_v47, %v706_v40  ;;  %v656_v49 = vmul.f32 %v648_v41, %v1705_v23  ;;  %v685_v14 = vmul.f32 %v677_v16, %v1658_v10 }
 0x171   : > { %v662_v7 = vadd.f32 1.4214138, %v654_v42  ;;  %v753_v62 = vsub.f32 1.0, %v745_v20  ;;  %v671_v4 = vmul.f32 %v663_v58, %v1688_v63  ;;  %v667_v30 = vmul.f32 %v659_v19, %v1683_v61 }
 0x172   : > { %v539_v27 = vand.u32 2147483647, %v1445_v1  ;;  %v754_v44 = vsub.f32 1.0, %v746_v54  ;;  %v664_v55 = vadd.f32 1.4214138, %v656_v49  ;;  %vm755_vm10 = vcmp.lt.f32.partialorder %v1434_v52, 0.0 }
 0x173   : > { %v693_v22 = vadd.f32 0.2548296, %v685_v14  ;;  %v670_v12 = vmul.f32 %v662_v7, %v1697_v36  ;;  %v769_v17 = vsub.f32 0.0, %v753_v62  ;;  %v679_v25 = vadd.f32 -0.28449672, %v671_v4 }
 0x174   : > { %v675_v47 = vadd.f32 -0.28449672, %v667_v30  ;;  %vm540_vm9 = vcmp.eq.f32.partialorder %v539_v27, 8.507059e+37  ;;  %v770_v15 = vsub.f32 0.0, %v754_v44  ;;  %v672_v9 = vmul.f32 %v664_v55, %v1705_v23 }
 0x175   : > { %v701_v18 = vmul.f32 %v693_v22, %v1658_v10  ;;  %v678_v46 = vadd.f32 -0.28449672, %v670_v12  ;;  %v777_v35 = vsel %vm761_vm5, %v769_v17, %v753_v62  ;;  %v687_v1 = vmul.f32 %v679_v25, %v1688_v63 }
 0x176   : > { %v683_v39 = vmul.f32 %v675_v47, %v1683_v61  ;;  %v1744_v50 = vsel %vm540_vm9, %v1491_v45, %v538_v3  ;;  %v785_v56 = vadd.f32 1.0, %v777_v35  ;;  %v778_v60 = vsel %vm762_vm7, %v770_v15, %v754_v44 }
 0x177   : > { %v680_v8 = vadd.f32 -0.28449672, %v672_v9  ;;  %v741_v40 = vmul.f32 %v1585_v31, %v701_v18  ;;  %v786_v41 = vadd.f32 1.0, %v778_v60  ;;  %v695_v10 = vadd.f32 0.2548296, %v687_v1 }
 0x178   : > { %v686_v16 = vmul.f32 %v678_v46, %v1697_v36  ;;  %v691_v0 = vadd.f32 0.2548296, %v683_v39  ;;  %v793_v42 = vmul.f32 %v785_v56, %v1476_v28  ;;  %v636_v45 = vmul.f32 1.0614054, %v1744_v50 }
 0x179   : > { %v688_v20 = vmul.f32 %v680_v8, %v1705_v23  ;;  %v749_v58 = vsub.f32 1.0, %v741_v40  ;;  %v794_v19 = vmul.f32 %v786_v41, %v1480_v34  ;;  %v703_v2 = vmul.f32 %v695_v10, %v1688_v63 }
 0x17a   : > { %v694_v3 = vadd.f32 0.2548296, %v686_v16  ;;  %v699_v54 = vmul.f32 %v691_v0, %v1683_v61  ;;  %v801_v31 = vmul.f32 %v1387_v33, %v793_v42  ;;  %v644_v7 = vadd.f32 -1.4531521, %v636_v45 }
 0x17b   : > { %v696_v49 = vadd.f32 0.2548296, %v688_v20  ;;  %v765_v14 = vsub.f32 0.0, %v749_v58  ;;  %v802_v62 = vmul.f32 %v1378_v29, %v794_v19  ;;  %v743_v28 = vmul.f32 %v1654_v37, %v703_v2 }
 0x17c   : > { %v702_v4 = vmul.f32 %v694_v3, %v1697_v36  ;;  %v739_v30 = vmul.f32 %v1519_v6, %v699_v54  ;;  %vm757_vm11 = vcmp.lt.f32.partialorder %v1466_v21, 0.0  ;;  %826 = vmatpush.msrb.mxu2 %v801_v31  ;;  %v652_v61 = vmul.f32 %v644_v7, %v1744_v50 }
 0x17d   : > { %v704_v34 = vmul.f32 %v696_v49, %v1705_v23  ;;  %846 = vmatpush.msrb.mxu3 %v802_v62  ;;  %v751_v63 = vsub.f32 1.0, %v743_v28  ;;  %v773_v27 = vsel %vm757_vm11, %v765_v14, %v749_v58  ;;  %v725_v37 = vmul.f32 1.442695, %v1478_v32 }
 0x17e   : > { %v742_v44 = vmul.f32 %v1606_v57, %v702_v4  ;;  %v747_v55 = vsub.f32 1.0, %v739_v30  ;;  %v477_v36 = vmul.f32 0.5, %v1453_v11  ;;  %v660_v22 = vadd.f32 1.4214138, %v652_v61 }
 0x17f   : > { %v744_v6 = vmul.f32 %v1666_v38, %v704_v34  ;;  %vm758_vm12 = vcmp.lt.f32.partialorder %v1487_v43, 0.0  ;;  %v767_v21 = vsub.f32 0.0, %v751_v63  ;;  %vm759_vm1 = vcmp.lt.f32.partialorder %v1525_v13, 0.0 }
 0x180   : > { %v750_v12 = vsub.f32 1.0, %v742_v44  ;;  %v763_v23 = vsub.f32 0.0, %v747_v55  ;;  %v781_v25 = vadd.f32 1.0, %v773_v27  ;;  %v668_v47 = vmul.f32 %v660_v22, %v1744_v50 }
 0x181   : > { %v752_v17 = vsub.f32 1.0, %v744_v6  ;;  %v479_v57 = vmul.f32 0.5, %v1505_v59  ;;  %v775_v15 = vsel %vm759_vm1, %v767_v21, %v751_v63  ;;  %v475_v35 = vmul.f32 0.5, %v1427_v48 }
 0x182   : > { %v766_v32 = vsub.f32 0.0, %v750_v12  ;;  %v771_v11 = vsel %vm755_vm10, %v763_v23, %v747_v55  ;;  %v783_v38 = vadd.f32 1.0, %v775_v15  ;;  %v676_v46 = vadd.f32 -0.28449672, %v668_v47 }
 0x183   : > { %v768_v9 = vsub.f32 0.0, %v752_v17  ;;  %v779_v18 = vadd.f32 1.0, %v771_v11  ;;  %1150 = vpow2.f32 %v725_v37  ;;  %vm760_vm2 = vcmp.lt.f32.partialorder %v1535_v24, 0.0 }
 0x184   : > { %v774_v13 = vsel %vm758_vm12, %v766_v32, %v750_v12  ;;  %v791_v1 = vmul.f32 %v783_v38, %v479_v57  ;;  %v789_v59 = vmul.f32 %v781_v25, %v477_v36  ;;  %v478_v60 = vmul.f32 0.5, %v1473_v26 }
 0x185   : > { %v776_v39 = vsel %vm760_vm2, %v768_v9, %v752_v17  ;;  %v782_v56 = vadd.f32 1.0, %v774_v13  ;;  %v480_v52 = vmul.f32 0.5, %v1517_v5  ;;  %v684_v40 = vmul.f32 %v676_v46, %v1744_v50  ;;  %v803_v5 = vld [vmem:[%s1855_s4] sm:$0xf] }
 0x186   : > { %v784_v8 = vadd.f32 1.0, %v776_v39  ;;  %v799_v41 = vmul.f32 %v1387_v33, %v791_v1  ;;  %v787_v48 = vmul.f32 %v779_v18, %v475_v35  ;;  %v797_v43 = vmul.f32 %v1387_v33, %v789_v59 }
 0x187   : > { %v790_v16 = vmul.f32 %v782_v56, %v478_v60  ;;  %v692_v24 = vadd.f32 0.2548296, %v684_v40  ;;  %vm810_vm13 = vcmask 261120   ;;  %vm756_vm15 = vcmp.lt.f32.partialorder %v1437_v53, 0.0 }
 0x188   : > { %v792_v10 = vmul.f32 %v784_v8, %v480_v52  ;;  %827 = vmatpush.msrb.mxu2 %v799_v41  ;;  %v795_v26 = vmul.f32 %v1387_v33, %v787_v48  ;;  %v476_v2 = vmul.f32 0.5, %v1431_v51 }
 0x189   : > { %v1151_v0 = vpop.eup %1150  ;;  %v700_v20 = vmul.f32 %v692_v24, %v1744_v50  ;;  %v798_v58 = vmul.f32 %v1378_v29, %v790_v16 }
 0x18a   : > { %v800_v42 = vmul.f32 %v1378_v29, %v792_v10  ;;  %828 = vmatpush.msrb.mxu2 %v797_v43 }
 0x18b   : > { %v740_v45 = vmul.f32 %v1151_v0, %v700_v20 }
 0x18c   : > { %847 = vmatpush.msrb.mxu3 %v800_v42  ;;  %829 = vmatpush.msrb.mxu2 %v795_v26 }
 0x18d   : > { %v748_v19 = vsub.f32 1.0, %v740_v45  ;;  %1041 = vmatmul.msk.f32.vlgmr.msrb.gmra.mxu2 %vm810_vm13, %v803_v5 }
 0x18e   : > { %848 = vmatpush.msrb.mxu3 %v798_v58 }
 0x18f   : > { %v764_v50 = vsub.f32 0.0, %v748_v19 }
 0x191   : > { %v772_v33 = vsel %vm756_vm15, %v764_v50, %v748_v19 }
 0x192   : > { %v780_v3 = vadd.f32 1.0, %v772_v33 }
 0x194   : > { %v788_v54 = vmul.f32 %v780_v3, %v476_v2 }
 0x196   : > { %v796_v31 = vmul.f32 %v1378_v29, %v788_v54 }
 0x198   : > { %849 = vmatpush.msrb.mxu3 %v796_v31 }
 0x199   : > { %1042 = vmatmul.msk.f32.vlgmr.msrb.gmra.mxu3 %vm810_vm13, %v803_v5 }
 0x19a   : > { %1179 = shalt.err (!%p1176_p5)
}
 0x19b   : > { %1055 = dma.vmem_to_hbm [thread:$0]  (%p1347_p4), %s907_s20, 32, %s909_s8, %s875_s10   ;;  %v808_v29 = vpop.permute.xlu2 %807 }
 0x19c   : > { %s1025_s19 = sshll.u32 %s1407_s23, 3  ;;  %s1051_s21 = sshll.u32 %s1254_s27, 3 }
 0x19d   : > { %s888_s17 = scalar_lea.hbm %s1857_s6, %s1051_s21  ;;  %s302_s0 = scalar_lea.vmem [#allocation2], %s1025_s19 }
 0x19e   : > { %s890_s1 = sshll.u32 %s302_s0, 4  ;;  %s892_s15 = sshll.u32 %s888_s17, 4  ;;  %s891_s1 = int_to_ptr.vmem [resolvable:$true] %s890_s1  ;;  %s893_s15 = int_to_ptr.hbm [resolvable:$true] %s892_s15 }
 0x19f   : > { %s870_s27 = scalar_lea.sflag [#allocation3], %s1407_s23  ;;  %s1194_s20 = sshra.s32 %s893_s15, 4  ;;  %s1195_s20 = int_to_ptr.hbm [resolvable:$true] %s1194_s20 }
 0x1a0   : > { %s1196_s8 = scalar_lea.hbm %s1195_s20, 8  ;;  %s1200_s18 = scalar_lea.hbm %s1857_s6, 16 }
 0x1a1   : > { %p1197_p6 = scmp.ne.s32.totalorder %s1195_s20, %s1196_s8  ;;  %p1201_p10 = scmp.lt.s32.totalorder %s1195_s20, %s1857_s6 }
 0x1a2   : > { %p1202_p11 = scmp.lt.s32.totalorder %s1200_s18, %s1196_s8 }
 0x1a3   : > { %p1198_p7 = pnand %p1197_p6, %p1347_p4 }
 0x1a4   : > { %p1203_p12 = por %p1202_p11, %p1201_p10 }
 0x1a5   : > { %p1199_p9 = pneg %p1198_p7 }
 0x1a7   : > { %p1204_p13 = pnand %p1203_p12, %p1199_p9 }
 0x210   : > { %v831_v51 = vpop.f32.mrf.mxu2 }
 0x211   : > { %v832_v14 = vadd.f32 %v831_v51, %v808_v29 }
 0x21c   : > { %v851_v53 = vpop.f32.mrf.mxu3 }
 0x21d   : > { %v852_v49 = vadd.f32 %v851_v53, %v808_v29 }
 0x21f   : > { %v856_v7 = vrot.slane %v852_v49, 4 }
 0x221   : > { %v857_v62 = vsel %vm341_vm0, %v832_v14, %v856_v7 }
 0x222   : > { %859 = vst [vmem:[%s302_s0] sm:$0xff] %v857_v62 }
 0x223   : > { %1207 = shalt.err (!%p1204_p13)
}
 0x224   : > { %1054 = dma.vmem_to_hbm [thread:$0]  (%p1347_p4), %s891_s1, 128, %s893_s15, %s870_s27  }
 0x225 PF: > { %p1065_p0 = scmp.ge.s32.totalorder %s1262_s29, 2  ;;  %s920_s23 = sand.u32 1, %s1242_s24  }
 0x226   : > { %s921_s21 = scalar_lea.sflag [#allocation3], %s920_s23 }
 0x227   : > { %p1059_p1 = pnand %p1065_p0, %p1354_p8 }
 0x229   : > { %p1060_p2 = pneg %p1059_p1 }
 0x22b   : > { %1233 = dma.done.wait (%p1060_p2), %s921_s21, 128  }
 0x22c   : > { %1235 = vsyncadd (%p1060_p2), %s921_s21, 4294967168  ;;  %s931_s22 = scalar_lea.sflag [#allocation5], %s920_s23 }
 0x22d   : > { %1237 = dma.done.wait (%p1060_p2), %s931_s22, 32  }
 0x22e   : > { %1239 = vsyncadd (%p1060_p2), %s931_s22, 4294967264  ;;  %s24_s29 = sadd.s32 1, %s1262_s29   ;;  %s1879_s24 = smov %s1246_s25 }
 0x22f   : > { %p21_p3 = scmp.ge.s32.totalorder %s24_s29, 4   ;;  %s1880_s25 = smov %s1250_s26 }
 0x230   : > { %s1881_s26 = smov %s1360_s14  ;;  %s1882_s27 = smov %s1258_s28 }
 0x231   : > { %s1883_s28 = smov %s1885_s9  ;;  %23 = sbr.rel (!%p21_p3) target bundleno = 9 (0x9), region = 96 }
 0x236   :  { %937 = vsyncpa [#allocation3], 1 }
 0x237   :  { %939 = vsyncpa [#allocation3 + $0x1], 1 }
 0x238   :  { %940 = vsyncpa [#allocation5], 1 }
 0x239   :  { %942 = vsyncpa [#allocation5 + $0x1], 1 }

</bundles_post_ra>
